<compile_context>
chip_gen: v5e
topology: v5e:2x2
jax: 0.10.0
libtpu: 0.0.40
codegen_flags: <defaults>
</compile_context>

<pallas_src>
import functools

import jax
import jax.numpy as jnp
from jax.experimental import pallas as pl
from jax.experimental.pallas import tpu as pltpu

_LANES = 128
_SUBLANES = 8


def _focal_partial_kernel(x_ref, t_ref, o_ref, *, tile_rows, total_n, need_mask):
    """Per-block partial sum of the numerically-stable BCE-with-logits terms."""
    x = x_ref[...].astype(jnp.float32)
    t = t_ref[...].astype(jnp.float32)

    # Stable BCE-with-logits per element (same formulation as PyTorch):
    #   max(x, 0) - x*t + log(1 + exp(-|x|))
    # exp/log1p go to the EUP slot; the rest is VPU — all hidden under HBM.
    bce = jnp.maximum(x, 0.0) - x * t + jnp.log1p(jnp.exp(-jnp.abs(x)))

    if need_mask:
        # Mask out padded elements / stale rows of a partial final block.
        # (Only emitted when a padded / ragged tile can actually occur.)
        i = pl.program_id(0)
        row_ids = jax.lax.broadcasted_iota(jnp.int32, (tile_rows, _LANES), 0)
        lane_ids = jax.lax.broadcasted_iota(jnp.int32, (tile_rows, _LANES), 1)
        gidx = i * (tile_rows * _LANES) + row_ids * _LANES + lane_ids
        bce = jnp.where(gidx < total_n, bce, 0.0)

    # VPU-only reduce to one (8, 128) vreg: sum across sublane-groups (axis 0
    # of the free reshape).  The expensive cross-lane reduce is deferred to
    # the tiny wrapper epilogue (num_blocks * 1024 floats, once).
    partial = jnp.sum(
        bce.reshape(tile_rows // _SUBLANES, _SUBLANES, _LANES), axis=0
    )
    o_ref[0] = partial


def focal_loss(logits, targets, *, alpha=0.25, gamma=2.0, tile_rows=2048):
    """Pallas TPU implementation of FocalLoss.forward (reduction='mean')."""
    x = jnp.reshape(logits, (-1,))
    t = jnp.reshape(targets, (-1,))
    total_n = x.shape[0]

    # Align total length to one (8, 128) tile so the 2-D reshape is legal and
    # rows is always a multiple of 8.  Padding (zeros, native dtype) is only
    # materialized in the rare case N % 1024 != 0 and is masked in-kernel.
    align = _SUBLANES * _LANES
    pad = (-total_n) % align
    if pad:
        x = jnp.concatenate([x, jnp.zeros((pad,), x.dtype)])
        t = jnp.concatenate([t, jnp.zeros((pad,), t.dtype)])
    rows = (total_n + pad) // _LANES
    x2 = x.reshape(rows, _LANES)
    t2 = t.reshape(rows, _LANES)

    tile_rows = min(int(tile_rows), rows)  # both multiples of 8
    num_blocks = pl.cdiv(rows, tile_rows)
    need_mask = (pad != 0) or (rows % tile_rows != 0)

    kernel = functools.partial(
        _focal_partial_kernel,
        tile_rows=tile_rows,
        total_n=total_n,
        need_mask=need_mask,
    )

    partials = pl.pallas_call(
        kernel,
        out_shape=jax.ShapeDtypeStruct((num_blocks, _SUBLANES, _LANES), jnp.float32),
        grid_spec=pltpu.PrefetchScalarGridSpec(
            num_scalar_prefetch=0,
            grid=(num_blocks,),
            in_specs=[
                pl.BlockSpec((tile_rows, _LANES), lambda i: (i, 0)),
                pl.BlockSpec((tile_rows, _LANES), lambda i: (i, 0)),
            ],
            out_specs=pl.BlockSpec((1, _SUBLANES, _LANES), lambda i: (i, 0, 0)),
        ),
        compiler_params=pltpu.CompilerParams(
            dimension_semantics=("parallel",),
        ),
    )(x2, t2)

    # Tiny epilogue (num_blocks * 1024 f32) — negligible vs the HBM-bound
    # per-element pass done in the kernel.
    bce_mean = jnp.sum(partials) / jnp.float32(total_n)
    base = 1.0 - jnp.exp(-bce_mean)
    g = float(gamma)
    # Integer gamma -> integer power (avoids the fragile exp(g*log(0)) path).
    modulator = base ** int(g) if g.is_integer() else base ** jnp.float32(g)
    return jnp.float32(alpha) * modulator * bce_mean


def focal_loss_ref(logits, targets, *, alpha=0.25, gamma=2.0):
    x = jnp.reshape(logits, (-1,)).astype(jnp.float32)
    t = jnp.reshape(targets, (-1,)).astype(jnp.float32)
    bce = jnp.mean(jnp.maximum(x, 0.0) - x * t + jnp.log1p(jnp.exp(-jnp.abs(x))))
    return alpha * (1.0 - jnp.exp(-bce)) ** gamma * bce


if __name__ == "__main__":
    key = jax.random.PRNGKey(0)
    k1, k2 = jax.random.split(key)

    # Small NCHW-style inputs consistent with a segmentation-like use case.
    logits = jax.random.normal(k1, (2, 4, 16, 16), dtype=jnp.float32)
    targets = jax.random.bernoulli(k2, 0.5, (2, 4, 16, 16)).astype(jnp.float32)

    alpha, gamma = 0.25, 2.0
    out = focal_loss(logits, targets, alpha=alpha, gamma=gamma)
    out = jax.block_until_ready(out)

    ref = focal_loss_ref(logits, targets, alpha=alpha, gamma=gamma)
    assert jnp.allclose(out, ref, rtol=1e-5, atol=1e-6), (out, ref)

    # Also exercise the masked-tail path (N not a multiple of 1024) with a
    # narrow-dtype target, which the kernel casts internally.
    logits_b = jax.random.normal(k1, (3, 5, 9, 7), dtype=jnp.float32)
    targets_b = jax.random.bernoulli(k2, 0.5, (3, 5, 9, 7)).astype(jnp.bfloat16)
    out_b = jax.block_until_ready(focal_loss(logits_b, targets_b, alpha=alpha, gamma=gamma))
    ref_b = focal_loss_ref(logits_b, targets_b, alpha=alpha, gamma=gamma)
    assert jnp.allclose(out_b, ref_b, rtol=1e-5, atol=1e-6), (out_b, ref_b)

    print("KERNEL_OK")
</pallas_src>

<mosaic_0001>
module attributes {stable_mosaic.version = 11 : i64} {
  func.func @_focal_partial_kernel(%arg0: i32, %arg1: memref<16x128xf32, #tpu.memory_space<vmem>>, %arg2: memref<16x128xf32, #tpu.memory_space<vmem>>, %arg3: memref<1x8x128xf32, #tpu.memory_space<vmem>>) attributes {dimension_semantics = [#tpu.dimension_semantics<parallel>], iteration_bounds = array<i64: 1>, scalar_prefetch = 0 : i64, scratch_operands = 0 : i64, tpu.core_type = #tpu.core_type<tc>, window_params = [{transform_indices = @transform_0, window_bounds = array<i64: 16, 128>}, {transform_indices = @transform_1, window_bounds = array<i64: 16, 128>}, {transform_indices = @transform_2, window_bounds = array<i64: 1, 8, 128>}]} {
    %c0 = arith.constant 0 : index
    %c0_0 = arith.constant 0 : index
    %0 = vector.load %arg1[%c0, %c0_0] : memref<16x128xf32, #tpu.memory_space<vmem>>, vector<16x128xf32>
    %c0_1 = arith.constant 0 : index
    %c0_2 = arith.constant 0 : index
    %1 = vector.load %arg2[%c0_1, %c0_2] : memref<16x128xf32, #tpu.memory_space<vmem>>, vector<16x128xf32>
    %cst = arith.constant 0.000000e+00 : f32
    %2 = vector.broadcast %cst : f32 to vector<16x128xf32>
    %3 = arith.maximumf %0, %2 : vector<16x128xf32>
    %4 = arith.mulf %0, %1 : vector<16x128xf32>
    %5 = arith.subf %3, %4 : vector<16x128xf32>
    %6 = math.absf %0 : vector<16x128xf32>
    %cst_3 = arith.constant 0.000000e+00 : f32
    %7 = vector.broadcast %cst_3 : f32 to vector<16x128xf32>
    %8 = arith.subf %7, %6 : vector<16x128xf32>
    %9 = math.exp %8 : vector<16x128xf32>
    %10 = math.log1p %9 : vector<16x128xf32>
    %11 = arith.addf %5, %10 : vector<16x128xf32>
    %12 = vector.shape_cast %11 : vector<16x128xf32> to vector<2x8x128xf32>
    %cst_4 = arith.constant dense<0.000000e+00> : vector<8x128xf32>
    %13 = vector.multi_reduction <add>, %12, %cst_4 [0] : vector<2x8x128xf32> to vector<8x128xf32>
    %c0_5 = arith.constant 0 : index
    %c0_6 = arith.constant 0 : index
    %c0_7 = arith.constant 0 : index
    %14 = vector.load %arg3[%c0_5, %c0_6, %c0_7] : memref<1x8x128xf32, #tpu.memory_space<vmem>>, vector<1x8x128xf32>
    %15 = vector.shape_cast %14 : vector<1x8x128xf32> to vector<8x128xf32>
    %16 = vector.shape_cast %13 : vector<8x128xf32> to vector<1x8x128xf32>
    tpu.vector_store %arg3[%c0_5, %c0_6, %c0_7], %16 {strides = array<i32>} : memref<1x8x128xf32, #tpu.memory_space<vmem>>, vector<1x8x128xf32>,
    return
  }
  func.func @transform_0(%arg0: i32) -> (i32, i32) {
    %c0_i32 = arith.constant 0 : i32
    %c0_i32_0 = arith.constant 0 : i32
    return %arg0, %c0_i32 : i32, i32
  }
  func.func @transform_1(%arg0: i32) -> (i32, i32) {
    %c0_i32 = arith.constant 0 : i32
    %c0_i32_0 = arith.constant 0 : i32
    return %arg0, %c0_i32 : i32, i32
  }
  func.func @transform_2(%arg0: i32) -> (i32, i32, i32) {
    %c0_i32 = arith.constant 0 : i32
    %c0_i32_0 = arith.constant 0 : i32
    %c0_i32_1 = arith.constant 0 : i32
    return %arg0, %c0_i32, %c0_i32_0 : i32, i32, i32
  }
}

</mosaic_0001>

<bundles_post_ra>
// kernel: tpu_custom_call.1
= control target key start
LH: loop header
LB: loop body
LE: loop exit
PB: predicated region body
PF: predicated region fallthrough
CT: control target
= control target key end

     0   :  { %7 = vsyncpa [#allocation3], 0  ;;  %s222_s0 = inlined_call_operand.hbm [shape: f32[16,128], index: 0, kind: input, shape index: {}]   ;;  %s223_s1 = inlined_call_operand.hbm [shape: f32[16,128], index: 1, kind: input, shape index: {}]   ;;  %s224_s2 = inlined_call_operand.hbm [shape: f32[1,8,128], index: 2, kind: output, shape index: {}]  }
   0x1   :  { %8 = vsyncpa [#allocation6], 0 }
   0x2   :  { %9 = vsyncpa [#allocation4], 0  ;;  %s14_s11 = sshll.u32 %s222_s0, 4  ;;  %s193_s12 = smov [#allocation2]   ;;  %s15_s11 = int_to_ptr.hbm [resolvable:$true] %s14_s11 }
   0x3   :  { %s16_s13 = sshll.u32 %s193_s12, 4  ;;  %s27_s16 = sshll.u32 %s223_s1, 4  ;;  %s17_s13 = int_to_ptr.vmem [resolvable:$true] %s16_s13  ;;  %s28_s16 = int_to_ptr.hbm [resolvable:$true] %s27_s16 }
   0x4   :  { %s194_s17 = smov 128   ;;  %s195_s18 = smov 8  }
   0x5   :  { %22 = dma.hbm_to_vmem [thread:$0]  %s15_s11, 256, %s17_s13, [#allocation3], %s194_s17, %s194_s17, %s195_s18  }
   0x6   :  { %s196_s19 = smov [#allocation5]  }
   0x7   :  { %s29_s20 = sshll.u32 %s196_s19, 4  ;;  %s30_s20 = int_to_ptr.vmem [resolvable:$true] %s29_s20 }
   0x8   :  { %35 = dma.hbm_to_vmem [thread:$0]  %s28_s16, 256, %s30_s20, [#allocation6], %s194_s17, %s194_s17, %s195_s18  }
   0x9   :  { %187 = dma.done.wait [#allocation3], 256  }
   0xa   :  { %188 = vsyncadd [#allocation3], 4294967040 }
   0xb   :  { %189 = dma.done.wait [#allocation6], 256  }
   0xc   :  { %190 = vsyncadd [#allocation6], 4294967040  ;;  %v44_v0 = vld [vmem:[#allocation2] sm:$0xff]  ;;  %v45_v1 = vld [vmem:[#allocation2 + $0x8] sm:$0xff]  ;;  %s197_s0 = smov [#allocation7]   ;;  %s91_s23 = sshll.u32 %s224_s2, 4  ;;  %s92_s23 = int_to_ptr.hbm [resolvable:$true] %s91_s23 }
   0xd   :  { %v54_v2 = vand.u32 2147483647, %v44_v0  ;;  %v55_v3 = vand.u32 2147483647, %v45_v1  ;;  %v46_v12 = vld [vmem:[#allocation5] sm:$0xff]  ;;  %v47_v15 = vld [vmem:[#allocation5 + $0x8] sm:$0xff] }
   0xe   :  { %v48_v17 = vmax.f32 %v44_v0, 0.0  ;;  %v50_v18 = vmul.f32 %v46_v12, %v44_v0  ;;  %v49_v21 = vmax.f32 %v45_v1, 0.0  ;;  %v51_v22 = vmul.f32 %v47_v15, %v45_v1  ;;  %s89_s1 = sshll.u32 %s197_s0, 4  ;;  %s90_s1 = int_to_ptr.vmem [resolvable:$true] %s89_s1 }
   0xf   :  { %v56_v4 = vsub.f32 0.0, %v54_v2  ;;  %v57_v5 = vsub.f32 0.0, %v55_v3 }
  0x10   :  { %v52_v26 = vsub.f32 %v48_v17, %v50_v18  ;;  %v53_v29 = vsub.f32 %v49_v21, %v51_v22 }
  0x11   :  { %v58_v6 = vmul.f32 1.442695, %v56_v4  ;;  %v60_v7 = vmul.f32 1.442695, %v57_v5 }
  0x13   :  { %107 = vpow2.f32 %v58_v6 }
  0x14   :  { %109 = vpow2.f32 %v60_v7 }
  0x19   :  { %v108_v8 = vpop.eup %107 }
  0x1a   :  { %v110_v9 = vpop.eup %109  ;;  %v62_v10 = vadd.f32 1.0, %v108_v8  ;;  %v65_v11 = vmul.f32 -0.5, %v108_v8  ;;  %v68_v19 = vand.u32 2147483647, %v108_v8 }
  0x1b   :  { %v71_v13 = vadd.f32 1.0, %v110_v9  ;;  %v74_v14 = vmul.f32 -0.5, %v110_v9  ;;  %v77_v23 = vand.u32 2147483647, %v110_v9 }
  0x1c   :  { %111 = vlog2.f32 %v62_v10  ;;  %v66_v16 = vadd.f32 1.0, %v65_v11  ;;  %vm69_vm0 = vcmp.lt.f32.partialorder %v68_v19, 0.0004427343 }
  0x1d   :  { %113 = vlog2.f32 %v71_v13  ;;  %v75_v20 = vadd.f32 1.0, %v74_v14  ;;  %vm78_vm1 = vcmp.lt.f32.partialorder %v77_v23, 0.0004427343 }
  0x1e   :  { %v67_v24 = vmul.f32 %v108_v8, %v66_v16 }
  0x1f   :  { %v76_v27 = vmul.f32 %v110_v9, %v75_v20 }
  0x22   :  { %v112_v25 = vpop.eup %111 }
  0x23   :  { %v114_v28 = vpop.eup %113  ;;  %v64_v30 = vmul.f32 0.6931472, %v112_v25 }
  0x24   :  { %v73_v31 = vmul.f32 0.6931472, %v114_v28 }
  0x25   :  { %v70_v32 = vsel %vm69_vm0, %v67_v24, %v64_v30 }
  0x26   :  { %v79_v33 = vsel %vm78_vm1, %v76_v27, %v73_v31  ;;  %v80_v34 = vadd.f32 %v70_v32, %v52_v26 }
  0x27   :  { %v81_v35 = vadd.f32 %v79_v33, %v53_v29 }
  0x29   :  { %v82_v36 = vadd.f32 %v81_v35, %v80_v34 }
  0x2b   :  { %83 = vst [vmem:[#allocation7] sm:$0xff] %v82_v36 }
  0x2c   :  { %94 = dma.vmem_to_hbm [thread:$0]  %s90_s1, 128, %s92_s23, [#allocation4]  }
  0x2d   :  { %191 = dma.done.wait [#allocation4], 128  }
  0x2e   :  { %192 = vsyncadd [#allocation4], 4294967168 }
  0x2f   :  { %99 = vsyncpa [#allocation3], 1 }
  0x30   :  { %100 = vsyncpa [#allocation6], 1 }
  0x31   :  { %101 = vsyncpa [#allocation4], 1 }

</bundles_post_ra>
